<compile_context>
chip_gen: v7x
topology: tpu7x:2x2x1
jax: 0.10.0
libtpu: 0.0.40
codegen_flags: <defaults>
</compile_context>

<pallas_src>
import functools

import jax
import jax.numpy as jnp
from jax import lax
from jax.experimental import pallas as pl
from jax.experimental.pallas import tpu as pltpu


def _round_up(x, m):
    return (x + m - 1) // m * m


# ----------------------------------------------------------------------------
# Pallas kernels
# ----------------------------------------------------------------------------
def _conv_in_lrelu_kernel(p_ref, w_ref, o_ref, *, eps, slope):
    """Fused im2col-matmul conv + InstanceNorm(affine=False) + LeakyReLU.

    p_ref: (B, P, CK)      patches for B samples (bf16 or f32)
    w_ref: (CK, Cpad)      conv weight, output channels zero-padded to 128-multiple
    o_ref: (B, P, Cpad)    f32 output
    """
    bt, pp, ck = p_ref.shape
    cpad = w_ref.shape[1]

    x = p_ref[...].reshape(bt * pp, ck)                       # lane dim unchanged
    y = jnp.dot(x, w_ref[...], preferred_element_type=jnp.float32)
    y = y.reshape(bt, pp, cpad)

    # InstanceNorm2d (affine=False, biased variance, eps): per-sample, per-channel
    # moments over the spatial axis P, computed in one pass.
    mean = jnp.mean(y, axis=1, keepdims=True)                 # (B, 1, Cpad)
    var = jnp.mean(y * y, axis=1, keepdims=True) - mean * mean
    y = (y - mean) * lax.rsqrt(var + eps)

    # LeakyReLU(negative_slope)
    o_ref[...] = jnp.where(y > 0, y, slope * y).astype(o_ref.dtype)


def _linear_relu_kernel(x_ref, w_ref, b_ref, o_ref, acc_ref):
    """y = relu(x @ W + b), K-tiled with a resident f32 accumulator."""
    k = pl.program_id(0)

    @pl.when(k == 0)
    def _():
        acc_ref[...] = jnp.zeros_like(acc_ref)

    acc_ref[...] += jnp.dot(x_ref[...], w_ref[...],
                            preferred_element_type=jnp.float32)

    @pl.when(k == pl.num_programs(0) - 1)
    def _():
        o_ref[...] = jnp.maximum(acc_ref[...] + b_ref[...], 0.0).astype(o_ref.dtype)


# ----------------------------------------------------------------------------
# Tile-size helpers (conservative so they also fit v7x's 64 MiB VMEM)
# ----------------------------------------------------------------------------
def _pick_batch_tile(n, per_sample_bytes, budget_bytes=12 << 20):
    cap = max(1, budget_bytes // max(per_sample_bytes, 1))
    if n > 1:
        cap = min(cap, max(1, n // 2))   # keep >=2 grid steps so both v7x TCs get work
    bt = max(1, min(n, cap))
    while n % bt:
        bt -= 1
    return bt


def _pick_k_tile(f, max_tk=4096):
    """Largest K tile: whole F if small / not 128-aligned, else a 128-multiple divisor."""
    if f % 128 != 0 or f <= max_tk:
        return f
    for tk in range(max_tk - max_tk % 128, 127, -128):
        if f % tk == 0:
            return tk
    return f


# ----------------------------------------------------------------------------
# Pallas wrappers
# ----------------------------------------------------------------------------
def conv_in_lrelu(patches, w_pad, cout, *, eps=1e-5, slope=0.01,
                  compute_dtype=jnp.bfloat16):
    """patches: (N, P, CK); w_pad: (CK, Cpad) -> (N, P, cout) f32."""
    n, p, ck = patches.shape
    cpad = w_pad.shape[1]
    in_item = jnp.dtype(compute_dtype).itemsize
    bt = _pick_batch_tile(n, p * (ck * in_item + cpad * 4))

    patches = patches.astype(compute_dtype)
    kernel = functools.partial(_conv_in_lrelu_kernel, eps=eps, slope=slope)

    y = pl.pallas_call(
        kernel,
        out_shape=jax.ShapeDtypeStruct((n, p, cpad), jnp.float32),
        grid=(n // bt,),
        in_specs=[
            pl.BlockSpec((bt, p, ck), lambda i: (i, 0, 0)),
            pl.BlockSpec((ck, cpad), lambda i: (0, 0)),
        ],
        out_specs=pl.BlockSpec((bt, p, cpad), lambda i: (i, 0, 0)),
        compiler_params=pltpu.CompilerParams(
            dimension_semantics=("parallel",),
            vmem_limit_bytes=48 * 1024 * 1024,
        ),
    )(patches, w_pad)
    return y[:, :, :cout]


def linear_relu(x, w_pad, b_pad, latent, *, compute_dtype=jnp.bfloat16):
    """x: (N, F); w_pad: (F, Lpad); b_pad: (1, Lpad) -> (N, latent) f32."""
    n, f = x.shape
    lpad = w_pad.shape[1]
    tk = _pick_k_tile(f)

    x = x.astype(compute_dtype)

    y = pl.pallas_call(
        _linear_relu_kernel,
        out_shape=jax.ShapeDtypeStruct((n, lpad), jnp.float32),
        grid=(f // tk,),
        in_specs=[
            pl.BlockSpec((n, tk), lambda k: (0, k)),
            pl.BlockSpec((tk, lpad), lambda k: (k, 0)),
            pl.BlockSpec((1, lpad), lambda k: (0, 0)),
        ],
        out_specs=pl.BlockSpec((n, lpad), lambda k: (0, 0)),
        scratch_shapes=[pltpu.VMEM((n, lpad), jnp.float32)],
        compiler_params=pltpu.CompilerParams(
            dimension_semantics=("arbitrary",),
            vmem_limit_bytes=48 * 1024 * 1024,
        ),
    )(x, w_pad, b_pad)
    return y[:, :latent]


# ----------------------------------------------------------------------------
# im2col (XLA glue)
# ----------------------------------------------------------------------------
def im2col_nhwc(x_nhwc, k, stride, pad):
    """(N, H, W, C) -> patches (N, Ho*Wo, k*k*C), last dim ordered (kh, kw, cin)."""
    n, h, w, c = x_nhwc.shape
    xp = jnp.pad(x_nhwc, ((0, 0), (pad, pad), (pad, pad), (0, 0)))
    ho = (h + 2 * pad - k) // stride + 1
    wo = (w + 2 * pad - k) // stride + 1
    cols = []
    for kh in range(k):
        for kw in range(k):
            cols.append(
                xp[:, kh: kh + ho * stride: stride, kw: kw + wo * stride: stride, :]
            )
    p = jnp.concatenate(cols, axis=-1)               # (N, Ho, Wo, k*k*C)
    return p.reshape(n, ho * wo, k * k * c), ho, wo


# ----------------------------------------------------------------------------
# Encoder forward
# ----------------------------------------------------------------------------
def encoder_forward(x_nchw, params, *, kernel_size, strides, channels, latent_size,
                    compute_dtype=jnp.bfloat16):
    """x: (N, Cin, H, W) -> (N, latent_size)."""
    pad = kernel_size // 2                            # same_padding (dilation=1)
    x = jnp.transpose(x_nchw, (0, 2, 3, 1))           # NCHW -> NHWC (once, at entry)
    for w_pad, cout, s in zip(params["convs"], channels, strides):
        patches, ho, wo = im2col_nhwc(x, kernel_size, s, pad)
        y = conv_in_lrelu(patches, w_pad, cout, compute_dtype=compute_dtype)
        x = y.reshape(y.shape[0], ho, wo, cout)
    # NHWC flatten; the CHW->HWC permutation is folded into the linear weight,
    # so this matches torch's x.view(N, -1) on the NCHW tensor.
    n = x.shape[0]
    flat = x.reshape(n, -1)
    wl_pad, bl_pad = params["linear"]
    return linear_relu(flat, wl_pad, bl_pad, latent_size, compute_dtype=compute_dtype)


# ----------------------------------------------------------------------------
# Parameters
# ----------------------------------------------------------------------------
def init_params(key, in_channels, channels, kernel_size, final_hw, latent_size):
    """Synthetic params in torch-equivalent layout.

    Conv bias is omitted: InstanceNorm(affine=False) subtracts the per-channel
    mean, so a per-channel bias cancels exactly (bit-identical output).
    """
    convs = []
    cin = in_channels
    for cout in channels:
        key, kw_ = jax.random.split(key)
        # conv weight as (k*k*cin, cout), rows ordered (kh, kw, cin) = im2col order
        w = 0.1 * jax.random.normal(
            kw_, (kernel_size * kernel_size * cin, cout), dtype=jnp.float32)
        convs.append(w)
        cin = cout
    fh, fw = final_hw
    linear_in = fh * fw * cin
    key, kw_, kb_ = jax.random.split(key, 3)
    # rows in torch's flatten order (c, h, w)
    wl = 0.1 * jax.random.normal(kw_, (linear_in, latent_size), dtype=jnp.float32)
    bl = 0.1 * jax.random.normal(kb_, (latent_size,), dtype=jnp.float32)
    return {"convs": convs, "linear": (wl, bl)}


def prepare_params(raw, *, final_hw, enc_channels, latent_size,
                   compute_dtype=jnp.bfloat16):
    """Pad lane dims to 128, cast MXU operands to bf16, fold the CHW->HWC permutation
    of torch's x.view(N,-1) into the linear weight (done once, off the hot path)."""
    convs = []
    for w in raw["convs"]:
        cout = w.shape[1]
        cpad = _round_up(cout, 128)
        convs.append(jnp.pad(w, ((0, 0), (0, cpad - cout))).astype(compute_dtype))

    wl, bl = raw["linear"]
    fh, fw = final_hw
    c = enc_channels
    l = latent_size
    lpad = _round_up(l, 128)
    wl_hwc = wl.reshape(c, fh, fw, l).transpose(1, 2, 0, 3).reshape(fh * fw * c, l)
    wl_pad = jnp.pad(wl_hwc, ((0, 0), (0, lpad - l))).astype(compute_dtype)
    bl_pad = jnp.pad(bl, (0, lpad - l)).reshape(1, lpad).astype(jnp.float32)
    return {"convs": convs, "linear": (wl_pad, bl_pad)}


if __name__ == "__main__":
    # Small config: spatial_dims=2, in_shape=(4,16,16), channels=(8,16),
    # strides=(2,2), kernel_size=3, latent_size=32, num_res_units=0.
    batch = 2
    in_channels = 4
    H = W = 16
    channels = (8, 16)
    strides = (2, 2)
    kernel_size = 3
    latent_size = 32

    # final spatial size after strided "same"-padded convs: 16 -> 8 -> 4
    pad = kernel_size // 2
    fh, fw = H, W
    for s in strides:
        fh = (fh + 2 * pad - kernel_size) // s + 1
        fw = (fw + 2 * pad - kernel_size) // s + 1

    key = jax.random.PRNGKey(0)
    key, kx = jax.random.split(key)
    x = jax.random.normal(kx, (batch, in_channels, H, W), dtype=jnp.float32)

    raw = init_params(key, in_channels, channels, kernel_size, (fh, fw), latent_size)
    params = prepare_params(raw, final_hw=(fh, fw), enc_channels=channels[-1],
                            latent_size=latent_size)

    fwd = jax.jit(functools.partial(
        encoder_forward, kernel_size=kernel_size, strides=strides,
        channels=channels, latent_size=latent_size))

    out = jax.block_until_ready(fwd(x, params))
    assert out.shape == (batch, latent_size), out.shape
    assert bool(jnp.all(jnp.isfinite(out)))
    assert bool(jnp.all(out >= 0.0))          # final ReLU
    print("KERNEL_OK")
</pallas_src>

<mosaic_0001>
module attributes {stable_mosaic.version = 11 : i64} {
  func.func @_conv_in_lrelu_kernel(%arg0: i32, %arg1: memref<1x64x36xbf16, #tpu.memory_space<vmem>>, %arg2: memref<36x128xbf16, #tpu.memory_space<vmem>>, %arg3: memref<1x64x128xf32, #tpu.memory_space<vmem>>) attributes {dimension_semantics = [#tpu.dimension_semantics<parallel>], iteration_bounds = array<i64: 2>, scalar_prefetch = 0 : i64, scratch_operands = 0 : i64, tpu.core_type = #tpu.core_type<tc>, window_params = [{transform_indices = @transform_0, window_bounds = array<i64: 1, 64, 36>}, {pipeline_mode = #tpu.pipeline_mode<synchronous>, transform_indices = @transform_1, window_bounds = array<i64: 36, 128>}, {transform_indices = @transform_2, window_bounds = array<i64: 1, 64, 128>}]} {
    %c0 = arith.constant 0 : index
    %c0_0 = arith.constant 0 : index
    %c0_1 = arith.constant 0 : index
    %0 = vector.load %arg1[%c0, %c0_0, %c0_1] : memref<1x64x36xbf16, #tpu.memory_space<vmem>>, vector<1x64x36xbf16>
    %1 = vector.shape_cast %0 : vector<1x64x36xbf16> to vector<64x36xbf16>
    %c0_2 = arith.constant 0 : index
    %c0_3 = arith.constant 0 : index
    %2 = vector.load %arg2[%c0_2, %c0_3] : memref<36x128xbf16, #tpu.memory_space<vmem>>, vector<36x128xbf16>
    %cst = arith.constant dense<0.000000e+00> : vector<64x128xf32>
    %3 = tpu.matmul %1, %2, %cst {dimension_numbers = #tpu.dot_dimension_numbers<[1], [0], [0], [1], [0, 0, 1, 1], [], []>} : vector<64x36xbf16>, vector<36x128xbf16>, vector<64x128xf32> -> vector<64x128xf32>
    %4 = vector.shape_cast %3 : vector<64x128xf32> to vector<1x64x128xf32>
    %cst_4 = arith.constant dense<0.000000e+00> : vector<1x128xf32>
    %5 = vector.multi_reduction <add>, %4, %cst_4 [1] : vector<1x64x128xf32> to vector<1x128xf32>
    %6 = vector.shape_cast %5 : vector<1x128xf32> to vector<1x1x128xf32>
    %cst_5 = arith.constant 6.400000e+01 : f32
    %7 = vector.broadcast %cst_5 : f32 to vector<1x1x128xf32>
    %8 = arith.divf %6, %7 : vector<1x1x128xf32>
    %9 = arith.mulf %4, %4 : vector<1x64x128xf32>
    %cst_6 = arith.constant dense<0.000000e+00> : vector<1x128xf32>
    %10 = vector.multi_reduction <add>, %9, %cst_6 [1] : vector<1x64x128xf32> to vector<1x128xf32>
    %11 = vector.shape_cast %10 : vector<1x128xf32> to vector<1x1x128xf32>
    %cst_7 = arith.constant 6.400000e+01 : f32
    %12 = vector.broadcast %cst_7 : f32 to vector<1x1x128xf32>
    %13 = arith.divf %11, %12 : vector<1x1x128xf32>
    %14 = arith.mulf %8, %8 : vector<1x1x128xf32>
    %15 = arith.subf %13, %14 : vector<1x1x128xf32>
    %16 = vector.broadcast %8 : vector<1x1x128xf32> to vector<1x64x128xf32>
    %17 = arith.subf %4, %16 : vector<1x64x128xf32>
    %cst_8 = arith.constant 9.99999974E-6 : f32
    %18 = vector.broadcast %cst_8 : f32 to vector<1x1x128xf32>
    %19 = arith.addf %15, %18 : vector<1x1x128xf32>
    %20 = math.rsqrt %19 : vector<1x1x128xf32>
    %21 = vector.broadcast %20 : vector<1x1x128xf32> to vector<1x64x128xf32>
    %22 = arith.mulf %17, %21 : vector<1x64x128xf32>
    %cst_9 = arith.constant 0.000000e+00 : f32
    %23 = vector.broadcast %cst_9 : f32 to vector<1x64x128xf32>
    %24 = arith.cmpf ogt, %22, %23 : vector<1x64x128xf32>
    %cst_10 = arith.constant 0.00999999977 : f32
    %25 = vector.broadcast %cst_10 : f32 to vector<1x64x128xf32>
    %26 = arith.mulf %25, %22 : vector<1x64x128xf32>
    %27 = arith.select %24, %22, %26 : vector<1x64x128xi1>, vector<1x64x128xf32>
    %c0_11 = arith.constant 0 : index
    %c0_12 = arith.constant 0 : index
    %c0_13 = arith.constant 0 : index
    %28 = vector.load %arg3[%c0_11, %c0_12, %c0_13] : memref<1x64x128xf32, #tpu.memory_space<vmem>>, vector<1x64x128xf32>
    tpu.vector_store %arg3[%c0_11, %c0_12, %c0_13], %27 {strides = array<i32>} : memref<1x64x128xf32, #tpu.memory_space<vmem>>, vector<1x64x128xf32>,
    return
  }
  func.func @transform_0(%arg0: i32) -> (i32, i32, i32) {
    %c0_i32 = arith.constant 0 : i32
    %c0_i32_0 = arith.constant 0 : i32
    %c0_i32_1 = arith.constant 0 : i32
    return %arg0, %c0_i32, %c0_i32_0 : i32, i32, i32
  }
  func.func @transform_1(%arg0: i32) -> (i32, i32) {
    %c0_i32 = arith.constant 0 : i32
    %c0_i32_0 = arith.constant 0 : i32
    %c0_i32_1 = arith.constant 0 : i32
    return %c0_i32, %c0_i32_0 : i32, i32
  }
  func.func @transform_2(%arg0: i32) -> (i32, i32, i32) {
    %c0_i32 = arith.constant 0 : i32
    %c0_i32_0 = arith.constant 0 : i32
    %c0_i32_1 = arith.constant 0 : i32
    return %arg0, %c0_i32, %c0_i32_0 : i32, i32, i32
  }
}

module attributes {stable_mosaic.version = 11 : i64} {
  func.func @_linear_relu_kernel(%arg0: i32, %arg1: memref<2x256xbf16, #tpu.memory_space<vmem>>, %arg2: memref<256x128xbf16, #tpu.memory_space<vmem>>, %arg3: memref<1x128xf32, #tpu.memory_space<vmem>>, %arg4: memref<2x128xf32, #tpu.memory_space<vmem>>, %arg5: memref<2x128xf32, #tpu.memory_space<vmem>>) attributes {dimension_semantics = [#tpu.dimension_semantics<arbitrary>], iteration_bounds = array<i64: 1>, scalar_prefetch = 0 : i64, scratch_operands = 1 : i64, tpu.core_type = #tpu.core_type<tc>, window_params = [{transform_indices = @transform_0, window_bounds = array<i64: 2, 256>}, {transform_indices = @transform_1, window_bounds = array<i64: 256, 128>}, {pipeline_mode = #tpu.pipeline_mode<synchronous>, transform_indices = @transform_2, window_bounds = array<i64: 1, 128>}, {pipeline_mode = #tpu.pipeline_mode<synchronous>, transform_indices = @transform_3, window_bounds = array<i64: 2, 128>}]} {
    %c0_i32 = arith.constant 0 : i32
    %0 = arith.cmpi eq, %arg0, %c0_i32 : i32
    %1 = arith.extui %0 : i1 to i32
    %c0_i32_0 = arith.constant 0 : i32
    %2 = arith.cmpi ne, %1, %c0_i32_0 : i32
    scf.if %2 {
      %cst_10 = arith.constant 0.000000e+00 : f32
      %12 = vector.broadcast %cst_10 : f32 to vector<2x128xf32>
      %c0_11 = arith.constant 0 : index
      %c0_12 = arith.constant 0 : index
      %13 = vector.load %arg5[%c0_11, %c0_12] : memref<2x128xf32, #tpu.memory_space<vmem>>, vector<2x128xf32>
      tpu.vector_store %arg5[%c0_11, %c0_12], %12 {strides = array<i32>} : memref<2x128xf32, #tpu.memory_space<vmem>>, vector<2x128xf32>,
    } else {
    }
    %c0 = arith.constant 0 : index
    %c0_1 = arith.constant 0 : index
    %3 = vector.load %arg5[%c0, %c0_1] : memref<2x128xf32, #tpu.memory_space<vmem>>, vector<2x128xf32>
    %c0_2 = arith.constant 0 : index
    %c0_3 = arith.constant 0 : index
    %4 = vector.load %arg1[%c0_2, %c0_3] : memref<2x256xbf16, #tpu.memory_space<vmem>>, vector<2x256xbf16>
    %c0_4 = arith.constant 0 : index
    %c0_5 = arith.constant 0 : index
    %5 = vector.load %arg2[%c0_4, %c0_5] : memref<256x128xbf16, #tpu.memory_space<vmem>>, vector<256x128xbf16>
    %cst = arith.constant dense<0.000000e+00> : vector<2x128xf32>
    %6 = tpu.matmul %4, %5, %cst {dimension_numbers = #tpu.dot_dimension_numbers<[1], [0], [0], [1], [0, 0, 1, 1], [], []>} : vector<2x256xbf16>, vector<256x128xbf16>, vector<2x128xf32> -> vector<2x128xf32>
    %7 = arith.addf %3, %6 : vector<2x128xf32>
    %c0_6 = arith.constant 0 : index
    %c0_7 = arith.constant 0 : index
    %8 = vector.load %arg5[%c0_6, %c0_7] : memref<2x128xf32, #tpu.memory_space<vmem>>, vector<2x128xf32>
    tpu.vector_store %arg5[%c0_6, %c0_7], %7 {strides = array<i32>} : memref<2x128xf32, #tpu.memory_space<vmem>>, vector<2x128xf32>,
    %c0_i32_8 = arith.constant 0 : i32
    %9 = arith.cmpi eq, %arg0, %c0_i32_8 : i32
    %10 = arith.extui %9 : i1 to i32
    %c0_i32_9 = arith.constant 0 : i32
    %11 = arith.cmpi ne, %10, %c0_i32_9 : i32
    scf.if %11 {
      %c0_10 = arith.constant 0 : index
      %c0_11 = arith.constant 0 : index
      %12 = vector.load %arg5[%c0_10, %c0_11] : memref<2x128xf32, #tpu.memory_space<vmem>>, vector<2x128xf32>
      %c0_12 = arith.constant 0 : index
      %c0_13 = arith.constant 0 : index
      %13 = vector.load %arg3[%c0_12, %c0_13] : memref<1x128xf32, #tpu.memory_space<vmem>>, vector<1x128xf32>
      %14 = vector.broadcast %13 : vector<1x128xf32> to vector<2x128xf32>
      %15 = arith.addf %12, %14 : vector<2x128xf32>
      %cst_14 = arith.constant 0.000000e+00 : f32
      %16 = vector.broadcast %cst_14 : f32 to vector<2x128xf32>
      %17 = arith.maximumf %15, %16 : vector<2x128xf32>
      %c0_15 = arith.constant 0 : index
      %c0_16 = arith.constant 0 : index
      %18 = vector.load %arg4[%c0_15, %c0_16] : memref<2x128xf32, #tpu.memory_space<vmem>>, vector<2x128xf32>
      tpu.vector_store %arg4[%c0_15, %c0_16], %17 {strides = array<i32>} : memref<2x128xf32, #tpu.memory_space<vmem>>, vector<2x128xf32>,
    } else {
    }
    return
  }
  func.func @transform_0(%arg0: i32) -> (i32, i32) {
    %c0_i32 = arith.constant 0 : i32
    %c0_i32_0 = arith.constant 0 : i32
    return %c0_i32, %arg0 : i32, i32
  }
  func.func @transform_1(%arg0: i32) -> (i32, i32) {
    %c0_i32 = arith.constant 0 : i32
    %c0_i32_0 = arith.constant 0 : i32
    return %arg0, %c0_i32 : i32, i32
  }
  func.func @transform_2(%arg0: i32) -> (i32, i32) {
    %c0_i32 = arith.constant 0 : i32
    %c0_i32_0 = arith.constant 0 : i32
    %c0_i32_1 = arith.constant 0 : i32
    return %c0_i32, %c0_i32_0 : i32, i32
  }
  func.func @transform_3(%arg0: i32) -> (i32, i32) {
    %c0_i32 = arith.constant 0 : i32
    %c0_i32_0 = arith.constant 0 : i32
    %c0_i32_1 = arith.constant 0 : i32
    return %c0_i32, %c0_i32_0 : i32, i32
  }
}

module attributes {stable_mosaic.version = 11 : i64} {
  func.func @_conv_in_lrelu_kernel(%arg0: i32, %arg1: memref<1x16x72xbf16, #tpu.memory_space<vmem>>, %arg2: memref<72x128xbf16, #tpu.memory_space<vmem>>, %arg3: memref<1x16x128xf32, #tpu.memory_space<vmem>>) attributes {dimension_semantics = [#tpu.dimension_semantics<parallel>], iteration_bounds = array<i64: 2>, scalar_prefetch = 0 : i64, scratch_operands = 0 : i64, tpu.core_type = #tpu.core_type<tc>, window_params = [{transform_indices = @transform_0, window_bounds = array<i64: 1, 16, 72>}, {pipeline_mode = #tpu.pipeline_mode<synchronous>, transform_indices = @transform_1, window_bounds = array<i64: 72, 128>}, {transform_indices = @transform_2, window_bounds = array<i64: 1, 16, 128>}]} {
    %c0 = arith.constant 0 : index
    %c0_0 = arith.constant 0 : index
    %c0_1 = arith.constant 0 : index
    %0 = vector.load %arg1[%c0, %c0_0, %c0_1] : memref<1x16x72xbf16, #tpu.memory_space<vmem>>, vector<1x16x72xbf16>
    %1 = vector.shape_cast %0 : vector<1x16x72xbf16> to vector<16x72xbf16>
    %c0_2 = arith.constant 0 : index
    %c0_3 = arith.constant 0 : index
    %2 = vector.load %arg2[%c0_2, %c0_3] : memref<72x128xbf16, #tpu.memory_space<vmem>>, vector<72x128xbf16>
    %cst = arith.constant dense<0.000000e+00> : vector<16x128xf32>
    %3 = tpu.matmul %1, %2, %cst {dimension_numbers = #tpu.dot_dimension_numbers<[1], [0], [0], [1], [0, 0, 1, 1], [], []>} : vector<16x72xbf16>, vector<72x128xbf16>, vector<16x128xf32> -> vector<16x128xf32>
    %4 = vector.shape_cast %3 : vector<16x128xf32> to vector<1x16x128xf32>
    %cst_4 = arith.constant dense<0.000000e+00> : vector<1x128xf32>
    %5 = vector.multi_reduction <add>, %4, %cst_4 [1] : vector<1x16x128xf32> to vector<1x128xf32>
    %6 = vector.shape_cast %5 : vector<1x128xf32> to vector<1x1x128xf32>
    %cst_5 = arith.constant 1.600000e+01 : f32
    %7 = vector.broadcast %cst_5 : f32 to vector<1x1x128xf32>
    %8 = arith.divf %6, %7 : vector<1x1x128xf32>
    %9 = arith.mulf %4, %4 : vector<1x16x128xf32>
    %cst_6 = arith.constant dense<0.000000e+00> : vector<1x128xf32>
    %10 = vector.multi_reduction <add>, %9, %cst_6 [1] : vector<1x16x128xf32> to vector<1x128xf32>
    %11 = vector.shape_cast %10 : vector<1x128xf32> to vector<1x1x128xf32>
    %cst_7 = arith.constant 1.600000e+01 : f32
    %12 = vector.broadcast %cst_7 : f32 to vector<1x1x128xf32>
    %13 = arith.divf %11, %12 : vector<1x1x128xf32>
    %14 = arith.mulf %8, %8 : vector<1x1x128xf32>
    %15 = arith.subf %13, %14 : vector<1x1x128xf32>
    %16 = vector.broadcast %8 : vector<1x1x128xf32> to vector<1x16x128xf32>
    %17 = arith.subf %4, %16 : vector<1x16x128xf32>
    %cst_8 = arith.constant 9.99999974E-6 : f32
    %18 = vector.broadcast %cst_8 : f32 to vector<1x1x128xf32>
    %19 = arith.addf %15, %18 : vector<1x1x128xf32>
    %20 = math.rsqrt %19 : vector<1x1x128xf32>
    %21 = vector.broadcast %20 : vector<1x1x128xf32> to vector<1x16x128xf32>
    %22 = arith.mulf %17, %21 : vector<1x16x128xf32>
    %cst_9 = arith.constant 0.000000e+00 : f32
    %23 = vector.broadcast %cst_9 : f32 to vector<1x16x128xf32>
    %24 = arith.cmpf ogt, %22, %23 : vector<1x16x128xf32>
    %cst_10 = arith.constant 0.00999999977 : f32
    %25 = vector.broadcast %cst_10 : f32 to vector<1x16x128xf32>
    %26 = arith.mulf %25, %22 : vector<1x16x128xf32>
    %27 = arith.select %24, %22, %26 : vector<1x16x128xi1>, vector<1x16x128xf32>
    %c0_11 = arith.constant 0 : index
    %c0_12 = arith.constant 0 : index
    %c0_13 = arith.constant 0 : index
    %28 = vector.load %arg3[%c0_11, %c0_12, %c0_13] : memref<1x16x128xf32, #tpu.memory_space<vmem>>, vector<1x16x128xf32>
    tpu.vector_store %arg3[%c0_11, %c0_12, %c0_13], %27 {strides = array<i32>} : memref<1x16x128xf32, #tpu.memory_space<vmem>>, vector<1x16x128xf32>,
    return
  }
  func.func @transform_0(%arg0: i32) -> (i32, i32, i32) {
    %c0_i32 = arith.constant 0 : i32
    %c0_i32_0 = arith.constant 0 : i32
    %c0_i32_1 = arith.constant 0 : i32
    return %arg0, %c0_i32, %c0_i32_0 : i32, i32, i32
  }
  func.func @transform_1(%arg0: i32) -> (i32, i32) {
    %c0_i32 = arith.constant 0 : i32
    %c0_i32_0 = arith.constant 0 : i32
    %c0_i32_1 = arith.constant 0 : i32
    return %c0_i32, %c0_i32_0 : i32, i32
  }
  func.func @transform_2(%arg0: i32) -> (i32, i32, i32) {
    %c0_i32 = arith.constant 0 : i32
    %c0_i32_0 = arith.constant 0 : i32
    %c0_i32_1 = arith.constant 0 : i32
    return %arg0, %c0_i32, %c0_i32_0 : i32, i32, i32
  }
}

</mosaic_0001>

<bundles_post_ra>
// kernel: encoder_forward.3
= control target key start
LH: loop header
LB: loop body
LE: loop exit
PB: predicated region body
PF: predicated region fallthrough
CT: control target
= control target key end

     0   :  { %s512_s9 = smov 0   ;;  %s556_s0 = inlined_call_operand.vmem [shape: bf16[2,64,36], index: 0, kind: input, shape index: {}]   ;;  %s557_s1 = inlined_call_operand.vmem [shape: bf16[36,128], index: 1, kind: input, shape index: {}]   ;;  %s558_s2 = inlined_call_operand.vmem [shape: f32[2,64,128], index: 2, kind: output, shape index: {}]  }
   0x1 LB: > { %s419_s10 = sadd.s32 4294967295, %s495_s9   ;;  %p423_p0 = scmp.ge.s32.totalorder %s495_s9, 1  ;;  %s495_s9 = sphi %s512_s9, %s12_s9  }
   0x2   : > { %p112_p1 = scmp.lt.s32.totalorder %s495_s9, 3 }
   0x4   : > { %p113_p2 = pnand %p423_p0, %p112_p1 }
   0x5   : > { %v480_v0 = vld [vmem:[%s557_s1] sm:$0xff] (!%p113_p2)   ;;  %v481_v1 = vld [vmem:[%s557_s1 + $0x8] sm:$0xff] (!%p113_p2)   ;;  %p134_p3 = scmp.lt.s32.totalorder (!%p113_p2), %s419_s10, 1  ;;  %v482_v2 = vld [vmem:[%s557_s1 + $0x10] ss:$0 sps:$4 sm:$0x33] (!%p113_p2)  }
   0x6   : > { %116 = sbr.rel (%p113_p2) target bundleno = 290 (0x122), region = 28  ;;  %450 = vmatprep.subr.bf16.mxu0 (!%p113_p2), %v480_v0  ;;  %464 = vmatprep.subr.bf16.mxu1 (!%p113_p2), %v480_v0  ;;  %vm206_vm0 = vcmask (!%p113_p2), 1041408   ;;  %vm193_vm1 = vcmask (!%p113_p2), 293888  }
   0x7   : > { %451 = vmatpush3.bf16.msra.mxu0 (!%p113_p2), %v480_v0  ;;  %467 = vmatpush3.bf16.msra.mxu1 (!%p113_p2), %v480_v0  ;;  %v208_v4 = vsel (!%p113_p2), %vm206_vm0, %v482_v2, 0 }
   0x8   : > { %452 = vmatprep.subr.bf16.mxu0 (!%p113_p2), %v481_v1  ;;  %465 = vmatprep.subr.bf16.mxu1 (!%p113_p2), %v481_v1 }
   0xb   : > { %453 = vmatpush3.bf16.msra.mxu0 (!%p113_p2), %v481_v1  ;;  %468 = vmatpush3.bf16.msra.mxu1 (!%p113_p2), %v481_v1 }
   0xc   : > { %470 = vmatprep.subr.msk.bf16.mxu0 (!%p113_p2), %vm206_vm0, %v482_v2  ;;  %471 = vmatprep.subr.msk.bf16.mxu1 (!%p113_p2), %vm206_vm0, %v482_v2 }
   0xd   : > { %s560_s10 = smov (!%p134_p3, %s419_s10), 1 }
   0xe   : > { %s441_s17 = sshll.u32 %s560_s10, 5  ;;  %s442_s21 = sshll.u32 %s560_s10, 6 }
   0xf   : > { %s138_s20 = scalar_lea.vmem %s556_s0, %s441_s17  ;;  %455 = vmatpush3.bf16.msra.mxu0 %v208_v4  ;;  %469 = vmatpush3.bf16.msra.mxu1 %v208_v4  ;;  %s143_s24 = scalar_lea.vmem %s558_s2, %s442_s21 }
  0x10   : > { %v483_v3 = vld [vmem:[%s138_s20] sm:$0xff]   ;;  %v484_v5 = vld [vmem:[%s138_s20 + $0x8] sm:$0xff]   ;;  %v485_v6 = vld [vmem:[%s138_s20 + $0x10] sm:$0xff]  }
  0x11   : > { %456 = vmatprep.mubr.msk.bf16.mxu0 %vm193_vm1, %v483_v3  ;;  %v486_v7 = vld [vmem:[%s138_s20 + $0x18] sm:$0xff]   ;;  %460 = vmatprep.mubr.msk.bf16.mxu1 %vm193_vm1, %v485_v6 }
  0x12   : > { %457 = vmatmul.mubr.msk.bf16.vlgmr.msra.gmra.mrb[0].mxu0 %vm193_vm1, %v484_v5  ;;  %461 = vmatmul.mubr.msk.bf16.vlgmr.msra.gmra.mrb[0].mxu1 %vm193_vm1, %v486_v7 }
  0xe5   : > { %v458_v8 = vpop.f32.mrb[0].mxu0  ;;  %v535_v9 = vpop.f32.mrb[0].mxu1 }
  0xe6   : > { %v244_v10 = vpop.f32.mrb[1].mxu0  ;;  %v260_v11 = vpop.f32.mrb[1].mxu1  ;;  %v292_v19 = vmul.f32 %v458_v8, %v458_v8  ;;  %v296_v31 = vmul.f32 %v535_v9, %v535_v9 }
  0xe7   : > { %v459_v12 = vpop.f32.mrb[2].mxu0  ;;  %v463_v13 = vpop.f32.mrb[2].mxu1  ;;  %v290_v16 = vmul.f32 %v244_v10, %v244_v10  ;;  %v294_v25 = vmul.f32 %v260_v11, %v260_v11 }
  0xe8   : > { %v247_v14 = vpop.f32.mrb[3].mxu0  ;;  %v263_v15 = vpop.f32.mrb[3].mxu1  ;;  %v293_v22 = vmul.f32 %v459_v12, %v459_v12  ;;  %v297_v34 = vmul.f32 %v463_v13, %v463_v13 }
  0xe9   : > { %v275_v17 = vadd.f32 %v247_v14, %v244_v10  ;;  %v291_v18 = vmul.f32 %v247_v14, %v247_v14  ;;  %v295_v30 = vmul.f32 %v263_v15, %v263_v15 }
  0xeb   : > { %v276_v20 = vadd.f32 %v458_v8, %v275_v17  ;;  %v298_v21 = vadd.f32 %v291_v18, %v290_v16 }
  0xed   : > { %v299_v23 = vadd.f32 %v298_v21, %v292_v19  ;;  %v277_v24 = vadd.f32 %v459_v12, %v276_v20 }
  0xef   : > { %v278_v26 = vadd.f32 %v277_v24, %v260_v11  ;;  %v300_v27 = vadd.f32 %v299_v23, %v293_v22 }
  0xf1   : > { %v301_v28 = vadd.f32 %v300_v27, %v294_v25  ;;  %v279_v29 = vadd.f32 %v278_v26, %v263_v15 }
  0xf3   : > { %v280_v32 = vadd.f32 %v535_v9, %v279_v29  ;;  %v302_v33 = vadd.f32 %v301_v28, %v295_v30 }
  0xf5   : > { %v281_v35 = vadd.f32 %v463_v13, %v280_v32  ;;  %v303_v36 = vadd.f32 %v302_v33, %v296_v31 }
  0xf7   : > { %v282_v37 = vrot.slane %v281_v35, 4  ;;  %v304_v38 = vadd.f32 %v303_v36, %v297_v34 }
  0xf9   : > { %v283_v39 = vadd.f32 %v282_v37, %v281_v35  ;;  %v305_v40 = vrot.slane %v304_v38, 4 }
  0xfb   : > { %v284_v41 = vrot.slane %v283_v39, 2  ;;  %v306_v42 = vadd.f32 %v305_v40, %v304_v38 }
  0xfd   : > { %v285_v43 = vadd.f32 %v284_v41, %v283_v39  ;;  %v307_v44 = vrot.slane %v306_v42, 2 }
  0xff   : > { %v286_v45 = vrot.slane %v285_v43, 1  ;;  %v308_v46 = vadd.f32 %v307_v44, %v306_v42 }
 0x101   : > { %v287_v47 = vadd.f32 %v286_v45, %v285_v43  ;;  %v309_v48 = vrot.slane %v308_v46, 1 }
 0x103   : > { %v289_v49 = vmul.f32 0.015625, %v287_v47  ;;  %v310_v50 = vadd.f32 %v309_v48, %v308_v46 }
 0x105   : > { %v311_v51 = vmul.f32 0.015625, %v310_v50  ;;  %v312_v52 = vmul.f32 %v289_v49, %v289_v49  ;;  %v314_v53 = vsub.f32 %v244_v10, %v289_v49  ;;  %v315_v54 = vsub.f32 %v247_v14, %v289_v49 }
 0x106   : > { %v316_v55 = vsub.f32 %v458_v8, %v289_v49  ;;  %v317_v56 = vsub.f32 %v459_v12, %v289_v49  ;;  %v318_v57 = vsub.f32 %v260_v11, %v289_v49  ;;  %v319_v58 = vsub.f32 %v263_v15, %v289_v49 }
 0x107   : > { %v313_v59 = vsub.f32 %v311_v51, %v312_v52  ;;  %v320_v60 = vsub.f32 %v535_v9, %v289_v49  ;;  %v321_v61 = vsub.f32 %v463_v13, %v289_v49 }
 0x109   : > { %v322_v62 = vadd.f32 1e-05, %v313_v59 }
 0x10b   : > { %487 = vrsqrt.f32 %v322_v62 }
 0x115   : > { %v488_v63 = vpop.eup %487 }
 0x116   : > { %v324_v0 = vmul.f32 %v488_v63, %v314_v53  ;;  %v325_v1 = vmul.f32 %v488_v63, %v315_v54  ;;  %v326_v2 = vmul.f32 %v488_v63, %v316_v55  ;;  %v327_v3 = vmul.f32 %v488_v63, %v317_v56 }
 0x117   : > { %v328_v4 = vmul.f32 %v488_v63, %v318_v57  ;;  %v329_v5 = vmul.f32 %v488_v63, %v319_v58  ;;  %v330_v6 = vmul.f32 %v488_v63, %v320_v60  ;;  %v331_v7 = vmul.f32 %v488_v63, %v321_v61 }
 0x118   : > { %vm332_vm2 = vcmp.gt.f32.partialorder %v324_v0, 0.0  ;;  %vm333_vm3 = vcmp.gt.f32.partialorder %v325_v1, 0.0  ;;  %vm334_vm4 = vcmp.gt.f32.partialorder %v326_v2, 0.0  ;;  %vm335_vm5 = vcmp.gt.f32.partialorder %v327_v3, 0.0 }
 0x119   : > { %vm336_vm6 = vcmp.gt.f32.partialorder %v328_v4, 0.0  ;;  %vm337_vm7 = vcmp.gt.f32.partialorder %v329_v5, 0.0  ;;  %vm338_vm8 = vcmp.gt.f32.partialorder %v330_v6, 0.0  ;;  %vm339_vm9 = vcmp.gt.f32.partialorder %v331_v7, 0.0 }
 0x11a   : > { %v340_v8 = vmul.f32 0.01, %v324_v0  ;;  %v341_v9 = vmul.f32 0.01, %v325_v1  ;;  %v342_v10 = vmul.f32 0.01, %v326_v2 }
 0x11b   : > { %v343_v11 = vmul.f32 0.01, %v327_v3  ;;  %v344_v12 = vmul.f32 0.01, %v328_v4  ;;  %v345_v13 = vmul.f32 0.01, %v329_v5 }
 0x11c   : > { %v346_v14 = vmul.f32 0.01, %v330_v6  ;;  %v347_v15 = vmul.f32 0.01, %v331_v7  ;;  %v348_v16 = vsel %vm332_vm2, %v324_v0, %v340_v8  ;;  %v349_v17 = vsel %vm333_vm3, %v325_v1, %v341_v9 }
 0x11d   : > { %v350_v18 = vsel %vm334_vm4, %v326_v2, %v342_v10  ;;  %v351_v19 = vsel %vm335_vm5, %v327_v3, %v343_v11  ;;  %v352_v20 = vsel %vm336_vm6, %v328_v4, %v344_v12  ;;  %v353_v21 = vsel %vm337_vm7, %v329_v5, %v345_v13  ;;  %356 = vst [vmem:[%s143_s24] sm:$0xff] %v348_v16 }
 0x11e   : > { %357 = vst [vmem:[%s143_s24 + $0x8] sm:$0xff] %v349_v17  ;;  %v354_v22 = vsel %vm338_vm8, %v330_v6, %v346_v14  ;;  %v355_v23 = vsel %vm339_vm9, %v331_v7, %v347_v15  ;;  %358 = vst [vmem:[%s143_s24 + $0x10] sm:$0xff] %v350_v18 }
 0x11f   : > { %359 = vst [vmem:[%s143_s24 + $0x18] sm:$0xff] %v351_v19  ;;  %360 = vst [vmem:[%s143_s24 + $0x20] sm:$0xff] %v352_v20 }
 0x120   : > { %361 = vst [vmem:[%s143_s24 + $0x28] sm:$0xff] %v353_v21  ;;  %362 = vst [vmem:[%s143_s24 + $0x30] sm:$0xff] %v354_v22 }
 0x121   : > { %363 = vst [vmem:[%s143_s24 + $0x38] sm:$0xff] %v355_v23 }
 0x122 PF: > { %s12_s9 = sadd.s32 1, %s495_s9  }
 0x123   : > { %p9_p4 = scmp.ge.s32.totalorder %s12_s9, 4  }
 0x125   :  { %11 = sbr.rel (!%p9_p4) target bundleno = 1 (0x1), region = 58 }

// kernel: encoder_forward.5
= control target key start
LH: loop header
LB: loop body
LE: loop exit
PB: predicated region body
PF: predicated region fallthrough
CT: control target
= control target key end

     0   :  { %v67_v9 = vlaneseq  ;;  %v329_v13 = vmov 1966171168   ;;  %s418_s0 = inlined_call_operand.vmem [shape: bf16[2,256], index: 0, kind: input, shape index: {}]   ;;  %s419_s1 = inlined_call_operand.vmem [shape: bf16[256,128], index: 1, kind: input, shape index: {}]   ;;  %s420_s2 = inlined_call_operand.vmem [shape: f32[1,128], index: 2, kind: input, shape index: {}]   ;;  %s421_s3 = inlined_call_operand.hbm [shape: f32[2,128], index: 3, kind: output, shape index: {}]  }
   0x1   :  { %v289_v0 = vld [vmem:[%s419_s1 + $0x40] sm:$0xff]   ;;  %v291_v2 = vld [vmem:[%s419_s1 + $0x48] sm:$0xff]   ;;  %v293_v4 = vld [vmem:[%s419_s1 + $0x50] sm:$0xff]   ;;  %v65_v14 = vunpack.c.l.s4 %v329_v13 }
   0x2   :  { %v290_v1 = vld [vmem:[%s419_s1] sm:$0xff]   ;;  %264 = vmatprep.subr.bf16.mxu0 %v289_v0  ;;  %v292_v3 = vld [vmem:[%s419_s1 + $0x8] sm:$0xff]   ;;  %v294_v5 = vld [vmem:[%s419_s1 + $0x10] sm:$0xff]   ;;  %v68_v15 = vshrl.u32 %v67_v9, 7 }
   0x3   :  { %265 = vmatpush3.bf16.msra.mxu0 %v290_v1  ;;  %v295_v6 = vld [vmem:[%s419_s1 + $0x58] sm:$0xff]   ;;  %v297_v8 = vld [vmem:[%s419_s1 + $0x60] sm:$0xff]   ;;  %v299_v11 = vld [vmem:[%s419_s1 + $0x68] sm:$0xff]  }
   0x4   :  { %266 = vmatprep.subr.bf16.mxu0 %v291_v2  ;;  %v296_v7 = vld [vmem:[%s419_s1 + $0x18] sm:$0xff]   ;;  %v298_v10 = vld [vmem:[%s419_s1 + $0x20] sm:$0xff]  }
   0x5   :  { %v246_v12 = vld.sshfl [vmem:[%s418_s0] sm:$0x11 pattern:$0x75316420] }
   0x7   :  { %267 = vmatpush3.bf16.msra.mxu0 %v292_v3 }
   0x8   :  { %268 = vmatprep.subr.bf16.mxu0 %v293_v4 }
   0xb   :  { %269 = vmatpush3.bf16.msra.mxu0 %v294_v5 }
   0xc   :  { %270 = vmatprep.subr.bf16.mxu0 %v295_v6 }
   0xf   :  { %271 = vmatpush3.bf16.msra.mxu0 %v296_v7 }
  0x10   :  { %272 = vmatprep.subr.bf16.mxu0 %v297_v8 }
  0x11   :  { %8 = vsyncpa [#allocation4], 0  ;;  %v300_v16 = vld [vmem:[%s419_s1 + $0x28] sm:$0xff]   ;;  %v63_v17 = vcombine.high %v246_v12, %v246_v12  ;;  %v66_v18 = vunpack.c.0.s8 %v65_v14  ;;  %v301_v19 = vld [vmem:[%s419_s1 + $0x70] sm:$0xff]   ;;  %v330_v26 = vmov 0.0  }
  0x12   :  { %v302_v21 = vld [vmem:[%s419_s1 + $0x30] sm:$0xff]   ;;  %v303_v23 = vld [vmem:[%s419_s1 + $0x78] sm:$0xff]   ;;  %20 = vst [vmem:[#allocation2] sm:$0x3] %v330_v26  ;;  %v263_v34 = vld [vmem:[%s420_s2] ss:$0 sm:$0xff] }
  0x13   :  { %273 = vmatpush3.bf16.msra.mxu0 %v298_v10  ;;  %v69_v20 = vsub.s32 %v66_v18, %v68_v15  ;;  %v304_v24 = vld [vmem:[%s419_s1 + $0x38] sm:$0xff]   ;;  %s331_s1 = smov [#allocation3]  }
  0x14   :  { %274 = vmatprep.subr.bf16.mxu0 %v299_v11  ;;  %s238_s20 = sshll.u32 %s331_s1, 4  ;;  %s239_s20 = int_to_ptr.vmem [resolvable:$true] %s238_s20 }
  0x15   :  { %v77_v22 = vrot.slane %v63_v17, %v69_v20  ;;  %v70_v25 = vrot.slane %v246_v12, %v69_v20  ;;  %s305_s21 = scalar_lea.vmem %s239_s20, 32  ;;  %p310_p1 = scmp.lt.s32.totalorder %s239_s20, %s239_s20 }
  0x16   :  { %p306_p0 = scmp.ne.s32.totalorder %s239_s20, %s305_s21  ;;  %p311_p2 = scmp.lt.s32.totalorder %s305_s21, %s305_s21 }
  0x17   :  { %275 = vmatpush3.bf16.msra.mxu0 %v300_v16  ;;  %208 = vmatprep.mubr.bf16.mxu0 %v77_v22 }
  0x18   :  { %276 = vmatprep.subr.bf16.mxu0 %v301_v19  ;;  %p312_p3 = por %p311_p2, %p310_p1 }
  0x19   :  { %v21_v28 = vld [vmem:[#allocation2] sm:$0x3] }
  0x1a   :  { %p313_p4 = pnand %p312_p3, %p306_p0 }
  0x1b   :  { %277 = vmatpush3.bf16.msra.mxu0 %v302_v21 }
  0x1c   :  { %278 = vmatprep.subr.bf16.mxu0 %v303_v23 }
  0x1f   :  { %279 = vmatpush3.bf16.msra.mxu0 %v304_v24 }
  0x22   :  { %209 = vmatmul.mubr.bf16.vlgmr.msra.gmra.mrb[0].mxu0 %v70_v25 }
  0xf5   :  { %v280_v27 = vpop.f32.mrb[0].mxu0 }
  0xf6   :  { %v281_v29 = vpop.f32.mrb[1].mxu0 }
  0xf7   :  { %v282_v30 = vadd.f32 %v281_v29, %v280_v27  ;;  %v283_v31 = vpop.f32.mrb[2].mxu0 }
  0xf8   :  { %v284_v32 = vpop.f32.mrb[3].mxu0 }
  0xf9   :  { %v216_v33 = vadd.f32 %v282_v30, %v21_v28 }
  0xfb   :  { %217 = vst [vmem:[#allocation2] sm:$0x3] %v216_v33 }
 0x102   :  { %v221_v35 = vld [vmem:[#allocation2] sm:$0x3] }
 0x103   :  { %v229_v36 = vadd.f32 %v263_v34, %v221_v35 }
 0x105   :  { %v230_v37 = vmax.f32 %v229_v36, 0.0 }
 0x107   :  { %231 = vst [vmem:[#allocation3] sm:$0x3] %v230_v37 }
 0x108   :  { %316 = shalt.err (!%p313_p4)
}
 0x109   :  { %s317_s24 = scalar_lea.hbm %s421_s3, 32 }
 0x10a   :  { %p318_p5 = scmp.ne.s32.totalorder %s421_s3, %s317_s24  ;;  %p321_p6 = scmp.lt.u32.totalorder %s317_s24, %s421_s3 }
 0x10c   :  { %p323_p7 = pnand %p321_p6, %p318_p5 }
 0x10e   :  { %326 = shalt.err (!%p323_p7)
}
 0x10f   :  { %241 = dma.vmem_to_hbm [thread:$0]  %s239_s20, 32, %s421_s3, [#allocation4]  }
 0x110   :  { %327 = dma.done.wait [#allocation4], 32  }
 0x111   :  { %328 = vsyncadd [#allocation4], 4294967264 }
 0x112   :  { %245 = vsyncpa [#allocation4], 1 }

// kernel: encoder_forward.4
= control target key start
LH: loop header
LB: loop body
LE: loop exit
PB: predicated region body
PF: predicated region fallthrough
CT: control target
= control target key end

     0   :  { %s410_s9 = smov 0   ;;  %s446_s0 = inlined_call_operand.vmem [shape: bf16[2,16,72], index: 0, kind: input, shape index: {}]   ;;  %s447_s1 = inlined_call_operand.vmem [shape: bf16[72,128], index: 1, kind: input, shape index: {}]   ;;  %s448_s2 = inlined_call_operand.vmem [shape: f32[2,16,128], index: 2, kind: output, shape index: {}]  }
   0x1 LB: > { %s327_s10 = sadd.s32 4294967295, %s391_s9   ;;  %p331_p0 = scmp.ge.s32.totalorder %s391_s9, 1  ;;  %s391_s9 = sphi %s410_s9, %s12_s9  }
   0x2   : > { %p112_p1 = scmp.lt.s32.totalorder %s391_s9, 3 }
   0x4   : > { %p113_p2 = pnand %p331_p0, %p112_p1 }
   0x5   : > { %v377_v0 = vld [vmem:[%s447_s1] sm:$0xff] (!%p113_p2)   ;;  %v393_v1 = vmov (!%p113_p2), 0.0   ;;  %v378_v2 = vld [vmem:[%s447_s1 + $0x8] sm:$0xff] (!%p113_p2)   ;;  %vm394_vm0 = vmmov (!%p113_p2), 0   ;;  %p134_p3 = scmp.lt.s32.totalorder (!%p113_p2), %s327_s10, 1  ;;  %v379_v3 = vld [vmem:[%s447_s1 + $0x10] sm:$0xff] (!%p113_p2)  }
   0x6   : > { %116 = sbr.rel (%p113_p2) target bundleno = 279 (0x117), region = 28  ;;  %353 = vmatprep.subr.bf16.mxu0 (!%p113_p2), %v393_v1  ;;  %363 = vmatprep.mubr.msk.bf16.mxu0 (!%p113_p2), %vm394_vm0, %v393_v1  ;;  %v380_v4 = vld [vmem:[%s447_s1 + $0x18] sm:$0xff] (!%p113_p2)   ;;  %v381_v5 = vld [vmem:[%s447_s1 + $0x20] ss:$0 sps:$4 sm:$0xff] (!%p113_p2)   ;;  %vm192_vm1 = vcmask (!%p113_p2), 1043456   ;;  %vm188_vm2 = vcmask (!%p113_p2), 588800  }
   0x7   : > { %354 = vmatpush3.bf16.msra.mxu0 (!%p113_p2), %v377_v0  ;;  %v194_v6 = vsel (!%p113_p2), %vm192_vm1, %v381_v5, 0 }
   0x8   : > { %355 = vmatprep.subr.bf16.mxu0 (!%p113_p2), %v393_v1 }
   0xb   : > { %356 = vmatpush3.bf16.msra.mxu0 (!%p113_p2), %v378_v2 }
   0xc   : > { %357 = vmatprep.subr.bf16.mxu0 (!%p113_p2), %v393_v1 }
   0xd   : > { %s450_s10 = smov (!%p134_p3, %s327_s10), 1 }
   0xe   : > { %s345_s17 = sshll.u32 %s450_s10, 3  ;;  %s346_s25 = sshll.u32 %s450_s10, 4 }
   0xf   : > { %s138_s20 = scalar_lea.vmem %s446_s0, %s345_s17  ;;  %358 = vmatpush3.bf16.msra.mxu0 %v379_v3  ;;  %s143_s28 = scalar_lea.vmem %s448_s2, %s346_s25 }
  0x10   : > { %359 = vmatprep.subr.bf16.mxu0 %v393_v1  ;;  %v382_v7 = vld [vmem:[%s138_s20] sm:$0xff]  }
  0x13   : > { %360 = vmatpush3.bf16.msra.mxu0 %v380_v4 }
  0x14   : > { %361 = vmatprep.subr.bf16.mxu0 %v393_v1 }
  0x17   : > { %362 = vmatpush3.bf16.msra.mxu0 %v194_v6 }
  0x1a   : > { %364 = vmatmul.mubr.msk.bf16.vlgmr.msra.gmra.mrb[0].mxu0 %vm188_vm2, %v382_v7 }
  0xed   : > { %v230_v8 = vpop.f32.mrb[0].mxu0 }
  0xee   : > { %v365_v9 = vpop.f32.mrb[1].mxu0  ;;  %v246_v11 = vmul.f32 %v230_v8, %v230_v8 }
  0xef   : > { %v233_v10 = vpop.f32.mrb[2].mxu0 }
  0xf0   : > { %v237_v12 = vadd.f32 %v233_v10, %v230_v8  ;;  %v247_v13 = vmul.f32 %v233_v10, %v233_v10  ;;  %v366_v14 = vpop.f32.mrb[3].mxu0 }
  0xf2   : > { %v238_v15 = vrot.slane %v237_v12, 4  ;;  %v248_v16 = vadd.f32 %v247_v13, %v246_v11 }
  0xf4   : > { %v239_v17 = vadd.f32 %v238_v15, %v237_v12  ;;  %v249_v18 = vrot.slane %v248_v16, 4 }
  0xf6   : > { %v240_v19 = vrot.slane %v239_v17, 2  ;;  %v250_v20 = vadd.f32 %v249_v18, %v248_v16 }
  0xf8   : > { %v241_v21 = vadd.f32 %v240_v19, %v239_v17  ;;  %v251_v22 = vrot.slane %v250_v20, 2 }
  0xfa   : > { %v242_v23 = vrot.slane %v241_v21, 1  ;;  %v252_v24 = vadd.f32 %v251_v22, %v250_v20 }
  0xfc   : > { %v243_v25 = vadd.f32 %v242_v23, %v241_v21  ;;  %v253_v26 = vrot.slane %v252_v24, 1 }
  0xfe   : > { %v245_v27 = vmul.f32 0.0625, %v243_v25  ;;  %v254_v28 = vadd.f32 %v253_v26, %v252_v24 }
 0x100   : > { %v255_v29 = vmul.f32 0.0625, %v254_v28  ;;  %v256_v30 = vmul.f32 %v245_v27, %v245_v27  ;;  %v258_v31 = vsub.f32 %v230_v8, %v245_v27  ;;  %v259_v32 = vsub.f32 %v233_v10, %v245_v27 }
 0x102   : > { %v257_v33 = vsub.f32 %v255_v29, %v256_v30 }
 0x104   : > { %v260_v34 = vadd.f32 1e-05, %v257_v33 }
 0x106   : > { %383 = vrsqrt.f32 %v260_v34 }
 0x110   : > { %v384_v35 = vpop.eup %383 }
 0x111   : > { %v262_v36 = vmul.f32 %v384_v35, %v258_v31  ;;  %v263_v37 = vmul.f32 %v384_v35, %v259_v32 }
 0x113   : > { %vm264_vm3 = vcmp.gt.f32.partialorder %v262_v36, 0.0  ;;  %vm265_vm4 = vcmp.gt.f32.partialorder %v263_v37, 0.0  ;;  %v266_v38 = vmul.f32 0.01, %v262_v36  ;;  %v267_v39 = vmul.f32 0.01, %v263_v37 }
 0x115   : > { %v268_v40 = vsel %vm264_vm3, %v262_v36, %v266_v38  ;;  %v269_v41 = vsel %vm265_vm4, %v263_v37, %v267_v39 }
 0x116   : > { %270 = vst [vmem:[%s143_s28] sm:$0xff] %v268_v40  ;;  %271 = vst [vmem:[%s143_s28 + $0x8] sm:$0xff] %v269_v41 }
 0x117 PF: > { %s12_s9 = sadd.s32 1, %s391_s9  }
 0x118   : > { %p9_p4 = scmp.ge.s32.totalorder %s12_s9, 4  }
 0x11a   :  { %11 = sbr.rel (!%p9_p4) target bundleno = 1 (0x1), region = 58 }

</bundles_post_ra>
